<compile_context>
chip_gen: v7x
topology: tpu7x:2x2x1
jax: 0.10.0
libtpu: 0.0.40
codegen_flags: <defaults>
</compile_context>

<pallas_src>
import jax
import jax.numpy as jnp
from jax.experimental import pallas as pl
from jax.experimental.pallas import tpu as pltpu


def _round_up(v, m):
    return ((v + m - 1) // m) * m


def _pick_tile(padded_dim, max_tile):
    """Largest multiple of 128 <= max_tile that divides `padded_dim` (itself a
    multiple of 128)."""
    best = 128
    t = 128
    while t <= min(max_tile, padded_dim):
        if padded_dim % t == 0:
            best = t
        t += 128
    return best


def _pad2(a, rows, cols):
    if rows == 0 and cols == 0:
        return a
    return jnp.pad(a, ((0, rows), (0, cols)))


# ----------------------------------------------------------------------------
# Kernels
# ----------------------------------------------------------------------------
def _gainmod_kernel(x_ref, w_ref, bias_ref, o_ref):
    # Resident-W / small path: K is NOT split, so no accumulator is needed.
    #   x_ref:    (tm, Kp)   activations tile (compute dtype, bf16 by default)
    #   w_ref:    (Kp, tn)   gains-folded weight column; its index_map is
    #             constant along the inner batch grid axis, so this block is
    #             DMA'd once per N-tile and stays resident across batch tiles.
    #   bias_ref: (1, tn)    f32
    #   o_ref:    (tm, tn)
    z = jnp.dot(x_ref[...], w_ref[...], preferred_element_type=jnp.float32)
    o_ref[...] = jnp.maximum(z + bias_ref[...], 0.0).astype(o_ref.dtype)


def _gainmod_ksplit_kernel(x_ref, w_ref, bias_ref, o_ref, acc_ref):
    # Fallback for weights too large for VMEM residency: K is split, f32
    # accumulator with pl.when init/finalize.  Note: with (i, j, k) grid order
    # the W column tiles are re-streamed once per batch tile; this path is only
    # taken when residency is impossible anyway.
    k = pl.program_id(2)

    @pl.when(k == 0)
    def _():
        acc_ref[...] = jnp.zeros_like(acc_ref)

    acc_ref[...] += jnp.dot(
        x_ref[...], w_ref[...], preferred_element_type=jnp.float32
    )

    @pl.when(k == pl.num_programs(2) - 1)
    def _():
        o_ref[...] = jnp.maximum(
            acc_ref[...] + bias_ref[...], 0.0
        ).astype(o_ref.dtype)


# ----------------------------------------------------------------------------
# Parameter preparation (one-time, hoisted out of the per-call path)
# ----------------------------------------------------------------------------
def prepare_params(weight, gains, bias, *, compute_dtype=jnp.bfloat16):
    """Fold gains into W, transpose to (K, N), pad to 128 multiples, cast.

    x @ W.T * g + b == x @ (g[:, None] * W).T + b, so in eval mode (static
    gains) the gains DMA and the per-element multiply are deleted for free.
    """
    output_dim, input_dim = weight.shape
    w_eff = weight * gains[:, None]              # fold gains into W rows
    w_t = w_eff.T.astype(compute_dtype)          # (K, N): MXU-native RHS
    Kp = _round_up(input_dim, 128)
    Np = _round_up(output_dim, 128)
    w_p = _pad2(w_t, Kp - input_dim, Np - output_dim)
    bias_p = jnp.pad(
        bias.astype(jnp.float32), (0, Np - output_dim)
    ).reshape(1, Np)
    return {
        "w": w_p,                 # (Kp, Np), gains folded, compute dtype
        "bias": bias_p,           # (1, Np), f32
        "input_dim": input_dim,
        "output_dim": output_dim,
    }


# ----------------------------------------------------------------------------
# Forward
# ----------------------------------------------------------------------------
def _resident_fits(tm, tn, Kp, cbytes, obytes, budget):
    need = (2 * tm * Kp * cbytes      # double-buffered activation tiles
            + 2 * Kp * tn * cbytes    # weight column buffers (fetched once/N-tile)
            + 2 * tm * tn * obytes    # double-buffered output tiles
            + 2 * tn * 4)             # bias
    return need <= budget


def gainmod_forward(x, params, *, vmem_budget_bytes=20 * 1024 * 1024,
                    force_ksplit=False, ksplit_tk=None):
    """relu(x @ W.T * gains + bias) with gains pre-folded into W."""
    w_p = params["w"]
    bias_p = params["bias"]
    input_dim = params["input_dim"]
    output_dim = params["output_dim"]

    B = x.shape[0]
    Kp, Np = w_p.shape
    cdtype = w_p.dtype
    out_dtype = x.dtype
    cbytes = jnp.dtype(cdtype).itemsize
    obytes = jnp.dtype(out_dtype).itemsize

    # Cast activations to the MXU compute dtype; pad K to the padded weight K.
    x_c = _pad2(x.astype(cdtype), 0, Kp - input_dim)

    # ---- small-problem fast path: whole problem in VMEM, no grid ------------
    if (not force_ksplit) and B <= 128 and Kp <= 512 and Np <= 512:
        out = pl.pallas_call(
            _gainmod_kernel,
            out_shape=jax.ShapeDtypeStruct((B, Np), out_dtype),
        )(x_c, w_p, bias_p)
        return out[:, :output_dim]

    # ---- resident-W tiled path (K not split) --------------------------------
    use_resident = False
    tm = tn = None
    if not force_ksplit:
        for tn_try in (_pick_tile(Np, 512), 128):
            tm_try = min(512, _round_up(B, 8))
            while True:
                if _resident_fits(tm_try, tn_try, Kp, cbytes, obytes,
                                  vmem_budget_bytes):
                    tm, tn, use_resident = tm_try, tn_try, True
                    break
                if tm_try <= 8:
                    break
                tm_try = max(8, ((tm_try // 2) + 7) // 8 * 8)
            if use_resident:
                break

    if use_resident:
        Mp = _round_up(B, tm)
        x_p = _pad2(x_c, Mp - B, 0)
        grid = (Np // tn, Mp // tm)   # batch axis innermost -> W stays resident
        out = pl.pallas_call(
            _gainmod_kernel,
            out_shape=jax.ShapeDtypeStruct((Mp, Np), out_dtype),
            grid_spec=pltpu.PrefetchScalarGridSpec(
                num_scalar_prefetch=0,
                grid=grid,
                in_specs=[
                    pl.BlockSpec((tm, Kp), lambda j, i: (i, 0)),
                    pl.BlockSpec((Kp, tn), lambda j, i: (0, j)),  # const along i
                    pl.BlockSpec((1, tn), lambda j, i: (0, j)),
                ],
                out_specs=pl.BlockSpec((tm, tn), lambda j, i: (i, j)),
            ),
            compiler_params=pltpu.CompilerParams(
                dimension_semantics=("parallel", "parallel"),
            ),
        )(x_p, w_p, bias_p)
        return out[:B, :output_dim]

    # ---- K-split fallback (very large K only) --------------------------------
    tn = _pick_tile(Np, 512)
    tk = ksplit_tk if ksplit_tk is not None else _pick_tile(Kp, 512)
    assert Kp % tk == 0
    tm = min(512, _round_up(B, 8))
    Mp = _round_up(B, tm)
    x_p = _pad2(x_c, Mp - B, 0)
    grid = (Mp // tm, Np // tn, Kp // tk)
    out = pl.pallas_call(
        _gainmod_ksplit_kernel,
        out_shape=jax.ShapeDtypeStruct((Mp, Np), out_dtype),
        grid_spec=pltpu.PrefetchScalarGridSpec(
            num_scalar_prefetch=0,
            grid=grid,
            in_specs=[
                pl.BlockSpec((tm, tk), lambda i, j, k: (i, k)),
                pl.BlockSpec((tk, tn), lambda i, j, k: (k, j)),
                pl.BlockSpec((1, tn), lambda i, j, k: (0, j)),
            ],
            out_specs=pl.BlockSpec((tm, tn), lambda i, j, k: (i, j)),
            scratch_shapes=[pltpu.VMEM((tm, tn), jnp.float32)],
        ),
        compiler_params=pltpu.CompilerParams(
            dimension_semantics=("parallel", "parallel", "arbitrary"),
        ),
    )(x_p, w_p, bias_p)
    return out[:B, :output_dim]


# ----------------------------------------------------------------------------
# Demo / correctness check
# ----------------------------------------------------------------------------
if __name__ == "__main__":
    key = jax.random.PRNGKey(0)
    k1, k2, k3, k4, k5, k6 = jax.random.split(key, 6)

    def reference(x, weight, gains, bias):
        return jnp.maximum((x @ weight.T) * gains + bias, 0.0)

    # Case 1: module-scale small shapes (B=8, input_dim=32, output_dim=64),
    # f32 compute -> no-grid whole-problem fast path; tight tolerance.
    B, D_in, D_out = 8, 32, 64
    x1 = jax.random.normal(k1, (B, D_in), dtype=jnp.float32)
    w1 = jax.random.normal(k2, (D_out, D_in), dtype=jnp.float32) * 0.01
    g1 = jax.random.uniform(k3, (D_out,), minval=0.5, maxval=1.5,
                            dtype=jnp.float32)
    b1 = 0.05 * jax.random.normal(k4, (D_out,), dtype=jnp.float32)
    p1 = prepare_params(w1, g1, b1, compute_dtype=jnp.float32)
    out1 = jax.block_until_ready(gainmod_forward(x1, p1))
    ref1 = reference(x1, w1, g1, b1)
    assert out1.shape == (B, D_out)
    assert jnp.allclose(out1, ref1, atol=1e-5, rtol=1e-5), "case 1 mismatch"

    # Case 2: bigger shapes -> resident-W tiled path, bf16 MXU with f32
    # accumulation; relaxed tolerance for the bf16 cast.
    B, D_in, D_out = 1024, 384, 640
    x2 = jax.random.normal(k5, (B, D_in), dtype=jnp.float32)
    w2 = jax.random.normal(k6, (D_out, D_in), dtype=jnp.float32) * 0.01
    g2 = jnp.full((D_out,), 1.5, dtype=jnp.float32)
    b2 = jnp.full((D_out,), 0.1, dtype=jnp.float32)
    p2 = prepare_params(w2, g2, b2)  # default bf16 compute
    out2 = jax.block_until_ready(gainmod_forward(x2, p2))
    ref2 = reference(x2, w2, g2, b2)
    assert out2.shape == (B, D_out)
    assert jnp.allclose(out2, ref2, atol=5e-2, rtol=5e-2), "case 2 mismatch"

    # Case 3: exercise the K-split fallback (accumulator path) explicitly.
    out3 = jax.block_until_ready(
        gainmod_forward(x2, p2, force_ksplit=True, ksplit_tk=128))
    assert jnp.allclose(out3, ref2, atol=5e-2, rtol=5e-2), "case 3 mismatch"

    print("KERNEL_OK")
</pallas_src>

<mosaic_0001>
module attributes {stable_mosaic.version = 11 : i64} {
  func.func @_gainmod_kernel(%arg0: memref<8x128xf32, #tpu.memory_space<vmem>>, %arg1: memref<128x128xf32, #tpu.memory_space<vmem>>, %arg2: memref<1x128xf32, #tpu.memory_space<vmem>>, %arg3: memref<8x128xf32, #tpu.memory_space<vmem>>) attributes {dimension_semantics = [], scalar_prefetch = 0 : i64, scratch_operands = 0 : i64, tpu.core_type = #tpu.core_type<tc>} {
    %c0 = arith.constant 0 : index
    %c0_0 = arith.constant 0 : index
    %0 = vector.load %arg0[%c0, %c0_0] : memref<8x128xf32, #tpu.memory_space<vmem>>, vector<8x128xf32>
    %c0_1 = arith.constant 0 : index
    %c0_2 = arith.constant 0 : index
    %1 = vector.load %arg1[%c0_1, %c0_2] : memref<128x128xf32, #tpu.memory_space<vmem>>, vector<128x128xf32>
    %cst = arith.constant dense<0.000000e+00> : vector<8x128xf32>
    %2 = tpu.matmul %0, %1, %cst {dimension_numbers = #tpu.dot_dimension_numbers<[1], [0], [0], [1], [0, 0, 1, 1], [], []>} : vector<8x128xf32>, vector<128x128xf32>, vector<8x128xf32> -> vector<8x128xf32>
    %c0_3 = arith.constant 0 : index
    %c0_4 = arith.constant 0 : index
    %3 = vector.load %arg2[%c0_3, %c0_4] : memref<1x128xf32, #tpu.memory_space<vmem>>, vector<1x128xf32>
    %4 = vector.broadcast %3 : vector<1x128xf32> to vector<8x128xf32>
    %5 = arith.addf %2, %4 : vector<8x128xf32>
    %cst_5 = arith.constant 0.000000e+00 : f32
    %6 = vector.broadcast %cst_5 : f32 to vector<8x128xf32>
    %7 = arith.maximumf %5, %6 : vector<8x128xf32>
    %c0_6 = arith.constant 0 : index
    %c0_7 = arith.constant 0 : index
    %8 = vector.load %arg3[%c0_6, %c0_7] : memref<8x128xf32, #tpu.memory_space<vmem>>, vector<8x128xf32>
    tpu.vector_store %arg3[%c0_6, %c0_7], %7 {strides = array<i32>} : memref<8x128xf32, #tpu.memory_space<vmem>>, vector<8x128xf32>,
    return
  }
}

</mosaic_0001>

<bundles_post_ra>
// kernel: tpu_custom_call.1
= control target key start
LH: loop header
LB: loop body
LE: loop exit
PB: predicated region body
PF: predicated region fallthrough
CT: control target
= control target key end

     0   :  { %8 = vsyncpa [#allocation3], 0  ;;  %s384_s0 = inlined_call_operand.hbm [shape: f32[8,128], index: 0, kind: input, shape index: {}]   ;;  %s385_s1 = inlined_call_operand.hbm [shape: f32[128,128], index: 1, kind: input, shape index: {}]   ;;  %s386_s2 = inlined_call_operand.vmem [shape: f32[1,128], index: 2, kind: input, shape index: {}]   ;;  %s387_s3 = inlined_call_operand.hbm [shape: f32[8,128], index: 3, kind: output, shape index: {}]  }
   0x1   :  { %9 = vsyncpa [#allocation6], 0 }
   0x2   :  { %10 = vsyncpa [#allocation4], 0  ;;  %s310_s12 = smov [#allocation2]   ;;  %s311_s14 = smov [#allocation5]  }
   0x3   :  { %s17_s13 = sshll.u32 %s310_s12, 4  ;;  %s26_s15 = sshll.u32 %s311_s14, 4  ;;  %s18_s13 = int_to_ptr.vmem [resolvable:$true] %s17_s13  ;;  %s338_s15 = int_to_ptr.vmem [resolvable:$true] %s26_s15 }
   0x4   :  { %s238_s18 = scalar_lea.hbm %s384_s0, 128 }
   0x5   :  { %p239_p0 = scmp.ne.s32.totalorder %s384_s0, %s238_s18  ;;  %p242_p1 = scmp.lt.u32.totalorder %s238_s18, %s384_s0 }
   0x7   :  { %p244_p2 = pnand %p242_p1, %p239_p0 }
   0x9   :  { %247 = shalt.err (!%p244_p2)
}
   0xa   :  { %s248_s23 = scalar_lea.vmem %s18_s13, 128  ;;  %p253_p4 = scmp.lt.s32.totalorder %s18_s13, %s18_s13 }
   0xb   :  { %p249_p3 = scmp.ne.s32.totalorder %s18_s13, %s248_s23  ;;  %p254_p5 = scmp.lt.s32.totalorder %s248_s23, %s248_s23 }
   0xd   :  { %p255_p6 = por %p254_p5, %p253_p4 }
   0xf   :  { %p256_p7 = pnand %p255_p6, %p249_p3 }
  0x11   :  { %259 = shalt.err (!%p256_p7)
}
  0x12   :  { %20 = dma.hbm_to_vmem [thread:$0]  %s384_s0, 128, %s18_s13, [#allocation3]  }
  0x13   :  { %s260_s28 = scalar_lea.hbm %s385_s1, 2048 }
  0x14   :  { %p261_p8 = scmp.ne.s32.totalorder %s385_s1, %s260_s28  ;;  %p264_p9 = scmp.lt.u32.totalorder %s260_s28, %s385_s1 }
  0x16   :  { %p266_p10 = pnand %p264_p9, %p261_p8 }
  0x18   :  { %269 = shalt.err (!%p266_p10)
}
  0x19   :  { %s270_s6 = scalar_lea.vmem %s338_s15, 2048  ;;  %p275_p12 = scmp.lt.s32.totalorder %s338_s15, %s338_s15 }
  0x1a   :  { %p271_p11 = scmp.ne.s32.totalorder %s338_s15, %s270_s6  ;;  %p276_p13 = scmp.lt.s32.totalorder %s270_s6, %s270_s6 }
  0x1c   :  { %p277_p0 = por %p276_p13, %p275_p12 }
  0x1e   :  { %p278_p1 = pnand %p277_p0, %p271_p11 }
  0x20   :  { %281 = shalt.err (!%p278_p1)
}
  0x21   :  { %s312_s0 = smov 128   ;;  %s313_s7 = smov 8  }
  0x22   :  { %32 = dma.hbm_to_vmem [thread:$0]  %s385_s1, 2048, %s338_s15, [#allocation6], %s312_s0, %s312_s0, %s313_s7  }
  0x23   :  { %304 = dma.done.wait [#allocation3], 128  }
  0x24   :  { %305 = vsyncadd [#allocation3], 4294967168 }
  0x25   :  { %306 = dma.done.wait [#allocation6], 2048  }
  0x26   :  { %307 = vsyncadd [#allocation6], 4294965248  ;;  %v314_v0 = vmov 0.0|0.0   ;;  %vm315_vm0 = vmmov 0   ;;  %v316_v1 = vmov 0.0   ;;  %v42_v2 = vld [vmem:[#allocation5] sm:$0xff] }
  0x27   :  { %206 = vmatprep.subr.bf16.mxu0 %v314_v0  ;;  %203 = vmatprep.mubr.msk.f32.mxu0 %vm315_vm0, %v316_v1  ;;  %v43_v3 = vld [vmem:[#allocation5 + $0x8] sm:$0xff]  ;;  %v44_v4 = vld [vmem:[#allocation5 + $0x10] sm:$0xff]  ;;  %v45_v6 = vld [vmem:[#allocation5 + $0x18] sm:$0xff]  ;;  %s317_s11 = smov [#allocation7]  }
  0x28   :  { %v207_v5 = vpack.c.bf16 %v43_v3, %v42_v2  ;;  %v210_v7 = vpack.c.bf16 %v45_v6, %v44_v4  ;;  %v46_v8 = vld [vmem:[#allocation5 + $0x20] sm:$0xff]  ;;  %v47_v9 = vld [vmem:[#allocation5 + $0x28] sm:$0xff]  ;;  %v48_v11 = vld [vmem:[#allocation5 + $0x30] sm:$0xff]  ;;  %s143_s12 = sshll.u32 %s317_s11, 4  ;;  %s144_s12 = int_to_ptr.vmem [resolvable:$true] %s143_s12 }
  0x29   :  { %v213_v10 = vpack.c.bf16 %v47_v9, %v46_v8  ;;  %v49_v12 = vld [vmem:[#allocation5 + $0x38] sm:$0xff]  ;;  %v50_v14 = vld [vmem:[#allocation5 + $0x40] sm:$0xff]  ;;  %v51_v15 = vld [vmem:[#allocation5 + $0x48] sm:$0xff]  ;;  %s282_s13 = scalar_lea.vmem %s144_s12, 128  ;;  %p287_p3 = scmp.lt.s32.totalorder %s144_s12, %s144_s12 }
  0x2a   :  { %208 = vmatpush3.bf16.msra.mxu0 %v207_v5  ;;  %v216_v13 = vpack.c.bf16 %v49_v12, %v48_v11  ;;  %v219_v16 = vpack.c.bf16 %v51_v15, %v50_v14  ;;  %v52_v17 = vld [vmem:[#allocation5 + $0x50] sm:$0xff]  ;;  %v53_v18 = vld [vmem:[#allocation5 + $0x58] sm:$0xff]  ;;  %v54_v20 = vld [vmem:[#allocation5 + $0x60] sm:$0xff]  ;;  %p283_p2 = scmp.ne.s32.totalorder %s144_s12, %s282_s13  ;;  %p288_p4 = scmp.lt.s32.totalorder %s282_s13, %s282_s13 }
  0x2b   :  { %209 = vmatprep.subr.bf16.mxu0 %v314_v0  ;;  %v222_v19 = vpack.c.bf16 %v53_v18, %v52_v17  ;;  %v55_v21 = vld [vmem:[#allocation5 + $0x68] sm:$0xff]  ;;  %v56_v23 = vld [vmem:[#allocation5 + $0x70] sm:$0xff]  ;;  %v57_v24 = vld [vmem:[#allocation5 + $0x78] sm:$0xff] }
  0x2c   :  { %v225_v22 = vpack.c.bf16 %v55_v21, %v54_v20  ;;  %v228_v25 = vpack.c.bf16 %v57_v24, %v56_v23  ;;  %v41_v26 = vld [vmem:[#allocation2] sm:$0xff]  ;;  %p289_p5 = por %p288_p4, %p287_p3 }
  0x2d   :  { %v153_v27 = vld [vmem:[%s386_s2] ss:$0 sm:$0xff] }
  0x2e   :  { %211 = vmatpush3.bf16.msra.mxu0 %v210_v7  ;;  %p290_p6 = pnand %p289_p5, %p283_p2 }
  0x2f   :  { %212 = vmatprep.subr.bf16.mxu0 %v314_v0 }
  0x32   :  { %214 = vmatpush3.bf16.msra.mxu0 %v213_v10 }
  0x33   :  { %215 = vmatprep.subr.bf16.mxu0 %v314_v0 }
  0x36   :  { %217 = vmatpush3.bf16.msra.mxu0 %v216_v13 }
  0x37   :  { %218 = vmatprep.subr.bf16.mxu0 %v314_v0 }
  0x3a   :  { %220 = vmatpush3.bf16.msra.mxu0 %v219_v16 }
  0x3b   :  { %221 = vmatprep.subr.bf16.mxu0 %v314_v0 }
  0x3e   :  { %223 = vmatpush3.bf16.msra.mxu0 %v222_v19 }
  0x3f   :  { %224 = vmatprep.subr.bf16.mxu0 %v314_v0 }
  0x42   :  { %226 = vmatpush3.bf16.msra.mxu0 %v225_v22 }
  0x43   :  { %227 = vmatprep.subr.bf16.mxu0 %v314_v0 }
  0x46   :  { %229 = vmatpush3.bf16.msra.mxu0 %v228_v25 }
  0x49   :  { %204 = vmatmul.mubr.f32.vlgmr.msra.gmra.mrb[0].mxu0 %v41_v26 }
 0x11c   :  { %v131_v28 = vpop.f32.mrb[0].mxu0 }
 0x11d   :  { %v132_v29 = vadd.f32 %v153_v27, %v131_v28  ;;  %v205_v30 = vpop.f32.mrb[1].mxu0 }
 0x11f   :  { %v135_v31 = vmax.f32 %v132_v29, 0.0 }
 0x121   :  { %136 = vst [vmem:[#allocation7] sm:$0xff] %v135_v31 }
 0x122   :  { %293 = shalt.err (!%p290_p6)
}
 0x123   :  { %s294_s16 = scalar_lea.hbm %s387_s3, 128 }
 0x124   :  { %p295_p7 = scmp.ne.s32.totalorder %s387_s3, %s294_s16  ;;  %p298_p8 = scmp.lt.u32.totalorder %s294_s16, %s387_s3 }
 0x126   :  { %p300_p9 = pnand %p298_p8, %p295_p7 }
 0x128   :  { %303 = shalt.err (!%p300_p9)
}
 0x129   :  { %146 = dma.vmem_to_hbm [thread:$0]  %s144_s12, 128, %s387_s3, [#allocation4]  }
 0x12a   :  { %308 = dma.done.wait [#allocation4], 128  }
 0x12b   :  { %309 = vsyncadd [#allocation4], 4294967168 }
 0x12c   :  { %150 = vsyncpa [#allocation3], 1 }
 0x12d   :  { %151 = vsyncpa [#allocation6], 1 }
 0x12e   :  { %152 = vsyncpa [#allocation4], 1 }

</bundles_post_ra>
